<compile_context>
chip_gen: v7x
topology: tpu7x:2x2x1
jax: 0.10.0
libtpu: 0.0.40
codegen_flags: <defaults>
</compile_context>

<pallas_src>
import jax
import jax.numpy as jnp
from jax import lax
from jax.experimental import pallas as pl
from jax.experimental.pallas import tpu as pltpu

N = 4        # batch
L = 8        # sequence length
D = 32       # config.hidden_size
EPS = 1e-12  # config.layer_norm_eps


def _bert_self_output_kernel(x_ref, res_ref, w_ref, b_ref, g_ref, beta_ref, y_ref):
    # dense: bf16 operands on the MXU, f32 accumulation
    h = jnp.dot(x_ref[...], w_ref[...], preferred_element_type=jnp.float32)
    h = h + b_ref[...]

    # dropout: identity at inference (no-op).

    # residual + TF-style LayerNorm (epsilon inside the square root), all in f32
    z = h + res_ref[...].astype(jnp.float32)
    u = jnp.mean(z, axis=-1, keepdims=True)
    zc = z - u                                   # computed once, reused below
    s = jnp.mean(zc * zc, axis=-1, keepdims=True)
    norm = zc * lax.rsqrt(s + EPS)               # rsqrt -> EUP slot
    y_ref[...] = (g_ref[...] * norm + beta_ref[...]).astype(y_ref.dtype)


def _pick_block_rows(m):
    """Largest row tile <= 512 that is a multiple of 16 (bf16 sublane tile),
    divides m, and yields >= 2 grid steps (pipelining + v7x 2-TC sharding).
    Falls back to the whole slab for tiny token counts."""
    for br in (512, 256, 128, 64, 32, 16):
        if m % br == 0 and m // br >= 2:
            return br
    return m


def bert_self_output(hidden_states, input_tensor, params, *, block_rows=None):
    n, l, d = hidden_states.shape
    m = n * l
    out_dtype = hidden_states.dtype

    # Fold batch and sequence into the sublane axis: one lane-dense slab.
    # x and W go to bf16 for the matmul; residual stays in its input dtype and
    # the residual + LayerNorm math runs in f32 inside the kernel.
    x2 = hidden_states.reshape(m, d).astype(jnp.bfloat16)
    r2 = input_tensor.reshape(m, d)
    w = params["w"].astype(jnp.bfloat16)                     # (in, out)
    b = params["b"].reshape(1, d).astype(jnp.float32)
    g = params["gamma"].reshape(1, d).astype(jnp.float32)
    beta = params["beta"].reshape(1, d).astype(jnp.float32)

    if block_rows is None:
        block_rows = _pick_block_rows(m)
    assert m % block_rows == 0, "block_rows must divide the token count"
    assert block_rows == m or block_rows % 16 == 0, \
        "block_rows must be a multiple of 16 (bf16 sublane tile) or the full slab"
    grid = (m // block_rows,)

    row_spec = pl.BlockSpec((block_rows, d), lambda i: (i, 0))
    rep = lambda shape: pl.BlockSpec(shape, lambda i: (0,) * len(shape))

    out_bytes = jnp.dtype(out_dtype).itemsize
    res_bytes = jnp.dtype(r2.dtype).itemsize

    # Working set: double-buffered x/res/y tiles + resident W + small params.
    tile_bytes = block_rows * d * (2 + res_bytes + out_bytes)
    working_set = 2 * tile_bytes + d * d * 2 + 3 * d * 4
    vmem_limit = int(min(100 * 2**20, max(4 * working_set, 8 * 2**20)))

    cost = pl.CostEstimate(
        flops=2 * m * d * d + 10 * m * d,
        transcendentals=m,                                   # one rsqrt per row
        bytes_accessed=(x2.size * 2 + r2.size * res_bytes + m * d * out_bytes
                        + d * d * 2 + 3 * d * 4),
    )

    y2 = pl.pallas_call(
        _bert_self_output_kernel,
        grid=grid,
        in_specs=[
            row_spec,                 # hidden_states rows (bf16)
            row_spec,                 # input_tensor (residual) rows
            rep((d, d)),              # W  (in_features, out_features), bf16
            rep((1, d)),              # b
            rep((1, d)),              # LayerNorm gamma
            rep((1, d)),              # LayerNorm beta
        ],
        out_specs=row_spec,
        out_shape=jax.ShapeDtypeStruct((m, d), out_dtype),
        # Rows are independent -> "parallel" lets v7x shard the >=2 grid steps
        # across its 2 TensorCores; neutral on single-TC v5e/v6e.
        compiler_params=pltpu.CompilerParams(
            dimension_semantics=("parallel",),
            vmem_limit_bytes=vmem_limit,
        ),
        cost_estimate=cost,
    )(x2, r2, w, b, g, beta)
    return y2.reshape(n, l, d)


def _reference(hidden_states, input_tensor, params):
    # Plain-JAX f32 reference mirroring the PyTorch module (dropout = identity).
    h = hidden_states @ params["w"] + params["b"]
    z = h + input_tensor
    u = jnp.mean(z, axis=-1, keepdims=True)
    s = jnp.mean((z - u) ** 2, axis=-1, keepdims=True)
    norm = (z - u) / jnp.sqrt(s + EPS)
    return params["gamma"] * norm + params["beta"]


if __name__ == "__main__":
    key = jax.random.PRNGKey(0)
    kx, kr, kw, kb = jax.random.split(key, 4)

    hidden_states = jax.random.normal(kx, (N, L, D), jnp.float32)
    input_tensor = jax.random.normal(kr, (N, L, D), jnp.float32)
    params = {
        # weight stored as (in_features, out_features) == W_torch.T so the
        # kernel computes y = x @ W + b directly on the MXU.
        "w": jax.random.normal(kw, (D, D), jnp.float32) * 0.02,
        "b": jax.random.normal(kb, (D,), jnp.float32) * 0.02,
        "gamma": jnp.ones((D,), jnp.float32),
        "beta": jnp.zeros((D,), jnp.float32),
    }

    y = bert_self_output(hidden_states, input_tensor, params)
    jax.block_until_ready(y)
    assert y.shape == (N, L, D)
    assert y.dtype == hidden_states.dtype

    # bf16 matmul inputs -> compare against the f32 reference with a loosened
    # tolerance (review correctness note).
    y_ref = _reference(hidden_states, input_tensor, params)
    assert jnp.allclose(y, y_ref, rtol=2e-2, atol=2e-2), \
        float(jnp.max(jnp.abs(y - y_ref)))

    print("KERNEL_OK")
</pallas_src>

<mosaic_0001>
module attributes {stable_mosaic.version = 11 : i64} {
  func.func @_bert_self_output_kernel(%arg0: i32, %arg1: memref<16x32xbf16, #tpu.memory_space<vmem>>, %arg2: memref<16x32xf32, #tpu.memory_space<vmem>>, %arg3: memref<32x32xbf16, #tpu.memory_space<vmem>>, %arg4: memref<1x32xf32, #tpu.memory_space<vmem>>, %arg5: memref<1x32xf32, #tpu.memory_space<vmem>>, %arg6: memref<1x32xf32, #tpu.memory_space<vmem>>, %arg7: memref<16x32xf32, #tpu.memory_space<vmem>>) attributes {dimension_semantics = [#tpu.dimension_semantics<parallel>], iteration_bounds = array<i64: 2>, scalar_prefetch = 0 : i64, scratch_operands = 0 : i64, tpu.core_type = #tpu.core_type<tc>, window_params = [{transform_indices = @transform_0, window_bounds = array<i64: 16, 32>}, {transform_indices = @transform_1, window_bounds = array<i64: 16, 32>}, {pipeline_mode = #tpu.pipeline_mode<synchronous>, transform_indices = @transform_2, window_bounds = array<i64: 32, 32>}, {pipeline_mode = #tpu.pipeline_mode<synchronous>, transform_indices = @transform_3, window_bounds = array<i64: 1, 32>}, {pipeline_mode = #tpu.pipeline_mode<synchronous>, transform_indices = @transform_4, window_bounds = array<i64: 1, 32>}, {pipeline_mode = #tpu.pipeline_mode<synchronous>, transform_indices = @transform_5, window_bounds = array<i64: 1, 32>}, {transform_indices = @transform_6, window_bounds = array<i64: 16, 32>}]} {
    %c0 = arith.constant 0 : index
    %c0_0 = arith.constant 0 : index
    %0 = vector.load %arg1[%c0, %c0_0] : memref<16x32xbf16, #tpu.memory_space<vmem>>, vector<16x32xbf16>
    %c0_1 = arith.constant 0 : index
    %c0_2 = arith.constant 0 : index
    %1 = vector.load %arg3[%c0_1, %c0_2] : memref<32x32xbf16, #tpu.memory_space<vmem>>, vector<32x32xbf16>
    %cst = arith.constant dense<0.000000e+00> : vector<16x32xf32>
    %2 = tpu.matmul %0, %1, %cst {dimension_numbers = #tpu.dot_dimension_numbers<[1], [0], [0], [1], [0, 0, 1, 1], [], []>} : vector<16x32xbf16>, vector<32x32xbf16>, vector<16x32xf32> -> vector<16x32xf32>
    %c0_3 = arith.constant 0 : index
    %c0_4 = arith.constant 0 : index
    %3 = vector.load %arg4[%c0_3, %c0_4] : memref<1x32xf32, #tpu.memory_space<vmem>>, vector<1x32xf32>
    %4 = vector.broadcast %3 : vector<1x32xf32> to vector<16x32xf32>
    %5 = arith.addf %2, %4 : vector<16x32xf32>
    %c0_5 = arith.constant 0 : index
    %c0_6 = arith.constant 0 : index
    %6 = vector.load %arg2[%c0_5, %c0_6] : memref<16x32xf32, #tpu.memory_space<vmem>>, vector<16x32xf32>
    %7 = arith.addf %5, %6 : vector<16x32xf32>
    %cst_7 = arith.constant dense<0.000000e+00> : vector<16xf32>
    %8 = vector.multi_reduction <add>, %7, %cst_7 [1] : vector<16x32xf32> to vector<16xf32>
    %9 = vector.shape_cast %8 : vector<16xf32> to vector<16x1xf32>
    %cst_8 = arith.constant 3.200000e+01 : f32
    %10 = vector.broadcast %cst_8 : f32 to vector<16x1xf32>
    %11 = arith.divf %9, %10 : vector<16x1xf32>
    %12 = vector.broadcast %11 : vector<16x1xf32> to vector<16x32xf32>
    %13 = arith.subf %7, %12 : vector<16x32xf32>
    %14 = arith.mulf %13, %13 : vector<16x32xf32>
    %cst_9 = arith.constant dense<0.000000e+00> : vector<16xf32>
    %15 = vector.multi_reduction <add>, %14, %cst_9 [1] : vector<16x32xf32> to vector<16xf32>
    %16 = vector.shape_cast %15 : vector<16xf32> to vector<16x1xf32>
    %cst_10 = arith.constant 3.200000e+01 : f32
    %17 = vector.broadcast %cst_10 : f32 to vector<16x1xf32>
    %18 = arith.divf %16, %17 : vector<16x1xf32>
    %cst_11 = arith.constant 9.99999996E-13 : f32
    %19 = vector.broadcast %cst_11 : f32 to vector<16x1xf32>
    %20 = arith.addf %18, %19 : vector<16x1xf32>
    %21 = math.rsqrt %20 : vector<16x1xf32>
    %22 = vector.broadcast %21 : vector<16x1xf32> to vector<16x32xf32>
    %23 = arith.mulf %13, %22 : vector<16x32xf32>
    %c0_12 = arith.constant 0 : index
    %c0_13 = arith.constant 0 : index
    %24 = vector.load %arg5[%c0_12, %c0_13] : memref<1x32xf32, #tpu.memory_space<vmem>>, vector<1x32xf32>
    %25 = vector.broadcast %24 : vector<1x32xf32> to vector<16x32xf32>
    %26 = arith.mulf %25, %23 : vector<16x32xf32>
    %c0_14 = arith.constant 0 : index
    %c0_15 = arith.constant 0 : index
    %27 = vector.load %arg6[%c0_14, %c0_15] : memref<1x32xf32, #tpu.memory_space<vmem>>, vector<1x32xf32>
    %28 = vector.broadcast %27 : vector<1x32xf32> to vector<16x32xf32>
    %29 = arith.addf %26, %28 : vector<16x32xf32>
    %c0_16 = arith.constant 0 : index
    %c0_17 = arith.constant 0 : index
    %30 = vector.load %arg7[%c0_16, %c0_17] : memref<16x32xf32, #tpu.memory_space<vmem>>, vector<16x32xf32>
    tpu.vector_store %arg7[%c0_16, %c0_17], %29 {strides = array<i32>} : memref<16x32xf32, #tpu.memory_space<vmem>>, vector<16x32xf32>,
    return
  }
  func.func @transform_0(%arg0: i32) -> (i32, i32) {
    %c0_i32 = arith.constant 0 : i32
    %c0_i32_0 = arith.constant 0 : i32
    return %arg0, %c0_i32 : i32, i32
  }
  func.func @transform_1(%arg0: i32) -> (i32, i32) {
    %c0_i32 = arith.constant 0 : i32
    %c0_i32_0 = arith.constant 0 : i32
    return %arg0, %c0_i32 : i32, i32
  }
  func.func @transform_2(%arg0: i32) -> (i32, i32) {
    %c0_i32 = arith.constant 0 : i32
    %c0_i32_0 = arith.constant 0 : i32
    %c0_i32_1 = arith.constant 0 : i32
    return %c0_i32, %c0_i32_0 : i32, i32
  }
  func.func @transform_3(%arg0: i32) -> (i32, i32) {
    %c0_i32 = arith.constant 0 : i32
    %c0_i32_0 = arith.constant 0 : i32
    %c0_i32_1 = arith.constant 0 : i32
    return %c0_i32, %c0_i32_0 : i32, i32
  }
  func.func @transform_4(%arg0: i32) -> (i32, i32) {
    %c0_i32 = arith.constant 0 : i32
    %c0_i32_0 = arith.constant 0 : i32
    %c0_i32_1 = arith.constant 0 : i32
    return %c0_i32, %c0_i32_0 : i32, i32
  }
  func.func @transform_5(%arg0: i32) -> (i32, i32) {
    %c0_i32 = arith.constant 0 : i32
    %c0_i32_0 = arith.constant 0 : i32
    %c0_i32_1 = arith.constant 0 : i32
    return %c0_i32, %c0_i32_0 : i32, i32
  }
  func.func @transform_6(%arg0: i32) -> (i32, i32) {
    %c0_i32 = arith.constant 0 : i32
    %c0_i32_0 = arith.constant 0 : i32
    return %arg0, %c0_i32 : i32, i32
  }
}

</mosaic_0001>

<bundles_post_ra>
// kernel: tpu_custom_call.1
= control target key start
LH: loop header
LB: loop body
LE: loop exit
PB: predicated region body
PF: predicated region fallthrough
CT: control target
= control target key end

     0   :  { %s1176_s0 = inlined_call_operand.hbm [shape: bf16[32,32], index: 0, kind: input, shape index: {}]   ;;  %s1177_s1 = inlined_call_operand.hbm [shape: f32[32,32], index: 1, kind: input, shape index: {}]   ;;  %s1178_s2 = inlined_call_operand.hbm [shape: bf16[32,32], index: 2, kind: input, shape index: {}]   ;;  %s1179_s3 = inlined_call_operand.vmem [shape: f32[1,32], index: 3, kind: input, shape index: {}]   ;;  %s1180_s4 = inlined_call_operand.vmem [shape: f32[1,32], index: 4, kind: input, shape index: {}]   ;;  %s1181_s5 = inlined_call_operand.vmem [shape: f32[1,32], index: 5, kind: input, shape index: {}]   ;;  %s1182_s6 = inlined_call_operand.hbm [shape: f32[32,32], index: 6, kind: output, shape index: {}]  }
   0x1   :  { %1188 = sst [smem:[#allocation15_spill]] %s1176_s0 }
   0x2   :  { %1189 = sst [smem:[#allocation16_spill]] %s1178_s2 }
   0x3   :  { %11 = vsyncpa [#allocation3], 0 }
   0x4   :  { %13 = vsyncpa [#allocation3 + $0x1], 0 }
   0x5   :  { %14 = vsyncpa [#allocation6], 0 }
   0x6   :  { %16 = vsyncpa [#allocation6 + $0x1], 0 }
   0x7   :  { %17 = vsyncpa [#allocation4], 0 }
   0x8   :  { %19 = vsyncpa [#allocation4 + $0x1], 0  ;;  %s902_s21 = smov 0   ;;  %s904_s22 = smov 0  }
   0x9   :  { %s906_s23 = smov 0   ;;  %s908_s24 = smov 0  }
   0xa LB: > { %1190 = sst [smem:[#allocation13_spill]] %s849_s23  ;;  %s923_s25 = sadd.s32 4294967295, %s853_s24   ;;  %s853_s24 = sphi %s908_s24, %s1214_s24   ;;  %s849_s23 = sphi %s906_s23, %s1213_s23   ;;  %s845_s22 = sphi %s904_s22, %s1212_s22   ;;  %s841_s21 = sphi %s902_s21, %s1211_s21  }
   0xb   : > { %s573_s26 = sadd.s32 4294967294, %s853_s24   ;;  %p45_p0 = scmp.ne.s32.totalorder %s845_s22, %s841_s21 }
   0xc   : > { %p1183_p1 = scmp.eq.s32.totalorder %s923_s25, 0  ;;  %p185_p3 = scmp.eq.s32.totalorder %s573_s26, 1 }
   0xd   : > { %p574_p5 = scmp.ge.s32.totalorder %s853_s24, 1  ;;  %p192_p7 = scmp.lt.s32.totalorder %s853_s24, 3 }
   0xe   : > { %p932_p4 = por %p1183_p1, %p45_p0  ;;  %p937_p6 = por %p185_p3, %p45_p0 }
   0xf   : > { %p942_p8 = pnand %p574_p5, %p192_p7  ;;  %s855_s30 = smov [#allocation7]  }
  0x10   : > { %s1191_s27 = scalar_select %p932_p4, 1, 0 }
  0x11   : > { %s1192_s28 = scalar_select %p937_p6, 1, 0 }
  0x12   : > { %s1193_s29 = scalar_select %p942_p8, 1, 0 }
  0x13   : > { %s204_s7 = sshll.u32 %s855_s30, 4  ;;  %p624_p9 = pneg %p942_p8  ;;  %s946_s7 = int_to_ptr.vmem [resolvable:$true] %s204_s7 }
  0x14   : > { %s958_s9 = sadd.s32 1, %s853_s24   ;;  %s32_s10 = sadd.s32 1, %s849_s23 }
  0x15   : > { %p953_p11 = pnand %p624_p9, %p1183_p1  ;;  %s29_s11 = ssub.s32 %s853_s24, %s958_s9 }
  0x16   : > { %s1195_s2 = sld [smem:[#allocation16_spill]] }
  0x17   : > { %p693_p13 = pneg %p953_p11 }
  0x1c   : > { %s691_s14 = scalar_lea.hbm %s1195_s2, 256 }
  0x1d   : > { %p692_p12 = scmp.ne.s32.totalorder %s1195_s2, %s691_s14  ;;  %p698_p5 = scmp.lt.u32.totalorder %s691_s14, %s1195_s2 }
  0x1f   : > { %p694_p0 = pnand %p693_p13, %p692_p12 }
  0x21   : > { %p695_p3 = pneg %p694_p0 }
  0x23   : > { %p700_p7 = pnand %p698_p5, %p695_p3 }
  0x25   : > { %703 = shalt.err (!%p700_p7)
}
  0x26   : > { %s704_s19 = scalar_lea.vmem %s946_s7, 256  ;;  %p712_p2 = scmp.lt.s32.totalorder %s946_s7, %s946_s7 }
  0x27   : > { %p705_p9 = scmp.ne.s32.totalorder %s946_s7, %s704_s19  ;;  %p713_p6 = scmp.lt.s32.totalorder %s704_s19, %s704_s19 }
  0x29   : > { %p707_p10 = pnand %p705_p9, %p693_p13  ;;  %p714_p4 = por %p713_p6, %p712_p2 }
  0x2b   : > { %p708_p1 = pneg %p707_p10 }
  0x2d   : > { %p715_p8 = pnand %p714_p4, %p708_p1 }
  0x2f   : > { %718 = shalt.err (!%p715_p8)
}
  0x30   : > { %s1186_s20 = smov 64   ;;  %s857_s26 = smov 4  }
  0x31   : > { %627 = dma.hbm_to_vmem [thread:$0]  (!%p953_p11), %s1195_s2, 256, %s946_s7, [#allocation6], %s1186_s20, %s1186_s20, %s857_s26  }
  0x32   : > { %p30_p1 = scmp.eq.s32.totalorder %s29_s11, 0  ;;  %p39_p2 = scmp.ne.s32.totalorder %s849_s23, %s845_s22 }
  0x33   : > { %p40_p4 = scmp.eq.s32.totalorder %s853_s24, 0  ;;  %p640_p6 = scmp.lt.s32.totalorder %s853_s24, 2 }
  0x34   : > { %s992_s13 = scalar_select %p30_p1, %s849_s23, %s32_s10  }
  0x35   : > { %p41_p8 = por %p40_p4, %p39_p2  ;;  %p1197_p10 = scmp.eq.s32.totalorder %s923_s25, 1 }
  0x36   : > { %1196 = sst [smem:[#allocation14_spill]] %s992_s13  ;;  %s1001_s8 = sand.u32 1, %s849_s23  }
  0x37   : > { %p996_p12 = por %p1197_p10, %p39_p2  ;;  %s600_s15 = sshll.u32 %s853_s24, 7 }
  0x38   : > { %s577_s16 = sshll.u32 %s1001_s8, 3  ;;  %s1199_s0 = sld [smem:[#allocation15_spill]] }
  0x39   : > { %s231_s10 = scalar_lea.vmem [#allocation2], %s577_s16  ;;  %p1010_p11 = pnand %p640_p6, %p41_p8 }
  0x3a   : > { %s238_s18 = sshll.u32 %s231_s10, 4  ;;  %s228_s12 = scalar_lea.sflag [#allocation3], %s1001_s8  ;;  %s1014_s18 = int_to_ptr.vmem [resolvable:$true] %s238_s18 }
  0x3b   : > { %p721_p0 = pneg %p1010_p11 }
  0x3e   : > { %s1008_s11 = scalar_lea.hbm %s1199_s0, %s600_s15  ;;  %s724_s7 = scalar_lea.hbm %s1199_s0, 256 }
  0x3f   : > { %s719_s20 = scalar_lea.hbm %s1008_s11, 128  ;;  %p725_p7 = scmp.lt.u32.totalorder %s1008_s11, %s1199_s0 }
  0x40   : > { %p720_p13 = scmp.ne.s32.totalorder %s1008_s11, %s719_s20  ;;  %p726_p9 = scmp.lt.u32.totalorder %s724_s7, %s719_s20 }
  0x41   : > { %p728_p2 = scmp.lt.u32.totalorder %s719_s20, %s1008_s11 }
  0x42   : > { %p722_p3 = pnand %p721_p0, %p720_p13  ;;  %p727_p1 = por %p726_p9, %p725_p7 }
  0x44   : > { %p723_p5 = pneg %p722_p3  ;;  %p729_p4 = por %p728_p2, %p727_p1 }
  0x46   : > { %p730_p6 = pnand %p729_p4, %p723_p5 }
  0x48   : > { %733 = shalt.err (!%p730_p6)
}
  0x49   : > { %s734_s30 = scalar_lea.vmem %s1014_s18, 128  ;;  %s858_s15 = smov [#allocation2]  }
  0x4a   : > { %p735_p8 = scmp.ne.s32.totalorder %s1014_s18, %s734_s30  ;;  %s739_s16 = sshll.u32 %s858_s15, 4  ;;  %s740_s16 = int_to_ptr.vmem [resolvable:$false] %s739_s16 }
  0x4b   : > { %s741_s17 = scalar_lea.vmem %s740_s16, 256  ;;  %p742_p3 = scmp.lt.s32.totalorder %s1014_s18, %s740_s16 }
  0x4c   : > { %p737_p10 = pnand %p735_p8, %p721_p0  ;;  %p743_p7 = scmp.lt.s32.totalorder %s741_s17, %s734_s30 }
  0x4e   : > { %p738_p13 = pneg %p737_p10  ;;  %p744_p9 = por %p743_p7, %p742_p3 }
  0x50   : > { %p745_p1 = pnand %p744_p9, %p738_p13 }
  0x52   : > { %748 = shalt.err (!%p745_p1)
}
  0x53   : > { %s1201_s20 = smov 64   ;;  %s580_s7 = sshll.u32 %s1001_s8, 4 }
  0x54   : > { %631 = dma.hbm_to_vmem [thread:$0]  (!%p1010_p11), %s1008_s11, 128, %s1014_s18, %s228_s12, %s1201_s20, %s1201_s20, %s857_s26  }
  0x55   : > { %s601_s10 = sshll.u32 %s853_s24, 8  ;;  %s252_s17 = scalar_lea.vmem [#allocation5], %s580_s7 }
  0x56   : > { %s1053_s16 = scalar_lea.hbm %s1177_s1, %s601_s10  ;;  %s259_s0 = sshll.u32 %s252_s17, 4  ;;  %s1055_s0 = int_to_ptr.vmem [resolvable:$true] %s259_s0 }
  0x57   : > { %s1202_s2 = sand.u32 1, %s853_s24   ;;  %s749_s23 = scalar_lea.hbm %s1053_s16, 256 }
  0x58   : > { %s1059_s13 = scalar_lea.sflag [#allocation6], %s1202_s2  ;;  %p750_p5 = scmp.ne.s32.totalorder %s1053_s16, %s749_s23 }
  0x59   : > { %s754_s11 = scalar_lea.hbm %s1177_s1, 512  ;;  %p755_p6 = scmp.lt.u32.totalorder %s1053_s16, %s1177_s1 }
  0x5a   : > { %p752_p2 = pnand %p750_p5, %p721_p0  ;;  %p756_p8 = scmp.lt.u32.totalorder %s754_s11, %s749_s23 }
  0x5b   : > { %p758_p13 = scmp.lt.u32.totalorder %s749_s23, %s1053_s16 }
  0x5c   : > { %p753_p4 = pneg %p752_p2  ;;  %p757_p10 = por %p756_p8, %p755_p6 }
  0x5e   : > { %p759_p3 = por %p758_p13, %p757_p10 }
  0x60   : > { %p760_p7 = pnand %p759_p3, %p753_p4 }
  0x62   : > { %763 = shalt.err (!%p760_p7)
}
  0x63   : > { %s764_s2 = scalar_lea.vmem %s1055_s0, 256  ;;  %s859_s20 = smov [#allocation5]  }
  0x64   : > { %p765_p9 = scmp.ne.s32.totalorder %s1055_s0, %s764_s2  ;;  %s769_s7 = sshll.u32 %s859_s20, 4  ;;  %s770_s7 = int_to_ptr.vmem [resolvable:$false] %s769_s7 }
  0x65   : > { %s771_s10 = scalar_lea.vmem %s770_s7, 512  ;;  %p772_p2 = scmp.lt.s32.totalorder %s1055_s0, %s770_s7 }
  0x66   : > { %p767_p1 = pnand %p765_p9, %p721_p0  ;;  %p773_p6 = scmp.lt.s32.totalorder %s771_s10, %s764_s2 }
  0x68   : > { %p768_p5 = pneg %p767_p1  ;;  %p774_p8 = por %p773_p6, %p772_p2 }
  0x6a   : > { %p775_p10 = pnand %p774_p8, %p768_p5 }
  0x6c   : > { %778 = shalt.err (!%p775_p10)
}
  0x6d   : > { %s860_s23 = smov 128   ;;  %s861_s30 = smov 8  }
  0x6e   : > { %634 = dma.hbm_to_vmem [thread:$0]  (!%p1010_p11), %s1053_s16, 256, %s1055_s0, %s1059_s13, %s860_s23, %s860_s23, %s861_s30  }
  0x6f   : > { %p1203_p0 = scmp.ne.s32.totalorder %s1193_s29, 0 }
  0x70   : > { %s1088_s15 = sand.u32 (!%p1203_p0), 1, %s845_s22   ;;  %p1204_p4 = scmp.ne.s32.totalorder (!%p1203_p0), %s1191_s27, 0 }
  0x71   : > { %271 = sbr.rel (%p1203_p0) target bundleno = 684 (0x2ac), region = 44  ;;  %s584_s17 = sshll.u32 (!%p1203_p0), %s1088_s15, 3 }
  0x72   : > { %s274_s26 = scalar_lea.sflag (!%p1203_p0), [#allocation3], %s1088_s15  ;;  %s277_s8 = scalar_lea.vmem (!%p1203_p0), [#allocation2], %s584_s17 }
  0x78   : > { %824 = dma.done.wait (%p1204_p4), %s274_s26, 128  }
  0x79   : > { %826 = vsyncadd (%p1204_p4), %s274_s26, 4294967168  ;;  %s282_s0 = sand.u32 1, %s923_s25   ;;  %s585_s29 = sshll.u32 %s1088_s15, 4 }
  0x7a   : > { %s283_s13 = scalar_lea.sflag [#allocation6], %s282_s0  ;;  %s286_s19 = scalar_lea.vmem [#allocation5], %s585_s29 }
  0x7b   : > { %828 = dma.done.wait (%p1204_p4), %s283_s13, 256  }
  0x7c   : > { %830 = vsyncadd (%p1204_p4), %s283_s13, 4294967040  ;;  %p1205_p11 = scmp.eq.s32.totalorder %s923_s25, 0 }
  0x7e   : > { %832 = dma.done.wait (%p1205_p11), [#allocation6], 256   ;;  %p1206_p13 = pmov %p1205_p11 }
  0x7f   : > { %v862_v0 = vmov 0.0   ;;  %vm863_vm0 = vmmov 0   ;;  %v684_v1 = vld [vmem:[#allocation7] sm:$0xff]   ;;  %v685_v2 = vld [vmem:[#allocation7 + $0x8] sm:$0xff]   ;;  %v686_v3 = vld [vmem:[%s277_s8] sm:$0xff]   ;;  %vm358_vm1 = vcmask 261120  }
  0x80   : > { %834 = vsyncadd (%p1206_p13), [#allocation6], 4294967040  ;;  %606 = vmatprep.subr.bf16.mxu0 %v862_v0  ;;  %610 = vmatprep.mubr.msk.bf16.mxu0 %vm863_vm0, %v862_v0  ;;  %v588_v4 = vld [vmem:[%s1179_s3] ss:$0 sm:$0xff]  ;;  %v404_v10 = vld [vmem:[%s286_s19 + $0x8] sm:$0xff]  ;;  %s602_s20 = sshll.u32 %s923_s25, 8 }
  0x81   : > { %607 = vmatpush3.bf16.msra.mxu0 %v684_v1  ;;  %v403_v6 = vld [vmem:[%s286_s19] sm:$0xff]  ;;  %s323_s7 = scalar_lea.vmem [#allocation8], %s585_s29  ;;  %s1129_s17 = scalar_lea.hbm %s1182_s6, %s602_s20 }
  0x82   : > { %608 = vmatprep.subr.bf16.mxu0 %v862_v0  ;;  %v593_v34 = vld [vmem:[%s1180_s4] ss:$0 sm:$0xff]  ;;  %s468_s10 = sshll.u32 %s323_s7, 4  ;;  %s455_s25 = scalar_lea.sflag [#allocation4], %s1088_s15  ;;  %s1131_s10 = int_to_ptr.vmem [resolvable:$true] %s468_s10 }
  0x83   : > { %v594_v36 = vld [vmem:[%s1181_s5] ss:$0 sm:$0xff]  ;;  %s779_s26 = scalar_lea.vmem %s1131_s10, 256  ;;  %s864_s8 = smov [#allocation8]  }
  0x84   : > { %p780_p3 = scmp.ne.s32.totalorder %s1131_s10, %s779_s26  ;;  %s783_s0 = sshll.u32 %s864_s8, 4  ;;  %s784_s0 = int_to_ptr.vmem [resolvable:$false] %s783_s0 }
  0x85   : > { %609 = vmatpush3.bf16.msra.mxu0 %v685_v2  ;;  %s785_s29 = scalar_lea.vmem %s784_s0, 512  ;;  %p786_p1 = scmp.lt.s32.totalorder %s1131_s10, %s784_s0 }
  0x86   : > { %p781_p7 = pnand %p780_p3, %p996_p12  ;;  %p787_p5 = scmp.lt.s32.totalorder %s785_s29, %s779_s26 }
  0x88   : > { %611 = vmatmul.mubr.msk.bf16.vlgmr.msra.gmra.mrb[0].mxu0 %vm358_vm1, %v686_v3  ;;  %p782_p9 = pneg %p781_p7  ;;  %p788_p2 = por %p787_p5, %p786_p1 }
  0x8a   : > { %p789_p6 = pnand %p788_p2, %p782_p9 }
 0x15b   : > { %v396_v5 = vpop.f32.mrb[0].mxu0 }
 0x15c   : > { %v397_v7 = vadd.f32 %v588_v4, %v396_v5  ;;  %v612_v8 = vpop.f32.mrb[1].mxu0 }
 0x15d   : > { %v399_v9 = vpop.f32.mrb[2].mxu0 }
 0x15e   : > { %v400_v11 = vadd.f32 %v588_v4, %v399_v9  ;;  %v613_v12 = vpop.f32.mrb[3].mxu0  ;;  %v405_v13 = vadd.f32 %v403_v6, %v397_v7 }
 0x160   : > { %v407_v14 = vsel %vm358_vm1, %v405_v13, 0.0  ;;  %v406_v15 = vadd.f32 %v404_v10, %v400_v11 }
 0x161   : > { %408 = vadd.xlane.f32.xlu0 %v407_v14 }
 0x162   : > { %v410_v16 = vsel %vm358_vm1, %v406_v15, 0.0 }
 0x165   : > { %411 = vadd.xlane.f32.xlu0 %v410_v16 }
 0x1ee   : > { %v409_v17 = vpop.xlane.xlu0 %408 }
 0x1ef   : > { %v414_v18 = vmul.f32 0.03125, %v409_v17 }
 0x1f1   : > { %v416_v19 = vsub.f32 %v405_v13, %v414_v18 }
 0x1f2   : > { %v412_v20 = vpop.xlane.xlu0 %411 }
 0x1f3   : > { %v415_v21 = vmul.f32 0.03125, %v412_v20  ;;  %v418_v22 = vmul.f32 %v416_v19, %v416_v19 }
 0x1f5   : > { %v417_v23 = vsub.f32 %v406_v15, %v415_v21  ;;  %v420_v24 = vsel %vm358_vm1, %v418_v22, 0.0 }
 0x1f6   : > { %421 = vadd.xlane.f32.xlu1 %v420_v24 }
 0x1f7   : > { %v419_v25 = vmul.f32 %v417_v23, %v417_v23 }
 0x1f9   : > { %v423_v26 = vsel %vm358_vm1, %v419_v25, 0.0 }
 0x1fa   : > { %424 = vadd.xlane.f32.xlu1 %v423_v26 }
 0x283   : > { %v422_v27 = vpop.xlane.xlu1 %421 }
 0x284   : > { %v426_v28 = vmul.f32 0.03125, %v422_v27 }
 0x286   : > { %v428_v29 = vadd.f32 1e-12, %v426_v28 }
 0x287   : > { %v425_v30 = vpop.xlane.xlu1 %424 }
 0x288   : > { %687 = vrsqrt.f32 %v428_v29  ;;  %v427_v31 = vmul.f32 0.03125, %v425_v30 }
 0x28a   : > { %v429_v32 = vadd.f32 1e-12, %v427_v31 }
 0x28c   : > { %689 = vrsqrt.f32 %v429_v32 }
 0x292   : > { %v688_v33 = vpop.eup %687 }
 0x293   : > { %v432_v35 = vmul.f32 %v688_v33, %v416_v19 }
 0x295   : > { %v441_v37 = vmul.f32 %v593_v34, %v432_v35 }
 0x296   : > { %v690_v38 = vpop.eup %689 }
 0x297   : > { %v450_v39 = vadd.f32 %v594_v36, %v441_v37  ;;  %v433_v40 = vmul.f32 %v690_v38, %v417_v23 }
 0x299   : > { %v442_v41 = vmul.f32 %v593_v34, %v433_v40  ;;  %452 = vst.msk [vmem:[%s323_s7] sm:$0xff] %vm358_vm1, %v450_v39 }
 0x29b   : > { %v451_v42 = vadd.f32 %v594_v36, %v442_v41 }
 0x29d   : > { %453 = vst.msk [vmem:[%s323_s7 + $0x8] sm:$0xff] %vm358_vm1, %v451_v42 }
 0x29e   : > { %792 = shalt.err (!%p789_p6)
}
 0x29f   : > { %s793_s13 = scalar_lea.hbm %s1129_s17, 256  ;;  %s797_s16 = scalar_lea.hbm %s1182_s6, 512 }
 0x2a0   : > { %p794_p8 = scmp.ne.s32.totalorder %s1129_s17, %s793_s13  ;;  %p798_p4 = scmp.lt.u32.totalorder %s1129_s17, %s1182_s6 }
 0x2a1   : > { %p799_p11 = scmp.lt.u32.totalorder %s797_s16, %s793_s13  ;;  %p801_p3 = scmp.lt.u32.totalorder %s793_s13, %s1129_s17 }
 0x2a2   : > { %p795_p10 = pnand %p794_p8, %p996_p12 }
 0x2a3   : > { %p800_p13 = por %p799_p11, %p798_p4 }
 0x2a4   : > { %p796_p0 = pneg %p795_p10 }
 0x2a5   : > { %p802_p7 = por %p801_p3, %p800_p13 }
 0x2a7   : > { %p803_p9 = pnand %p802_p7, %p796_p0 }
 0x2a9   : > { %806 = shalt.err (!%p803_p9)
}
 0x2aa   : > { %s865_s12 = smov 128   ;;  %s866_s2 = smov 8  }
 0x2ab   : > { %622 = dma.vmem_to_hbm [thread:$0]  (%p996_p12), %s1131_s10, 256, %s1129_s17, %s455_s25, %s865_s12, %s865_s12, %s866_s2  }
 0x2ac PF: > { %s483_s20 = sand.u32 1, %s841_s21   ;;  %p1207_p1 = scmp.ne.s32.totalorder %s1192_s28, 0 }
 0x2ad   : > { %p1208_p5 = scmp.ge.s32.totalorder %s853_s24, 2  ;;  %s484_s7 = scalar_lea.sflag [#allocation4], %s483_s20 }
 0x2af   : > { %p636_p2 = pnand %p1208_p5, %p1207_p1 }
 0x2b1   : > { %836 = dma.done.wait (!%p636_p2), %s484_s7, 256  }
 0x2b2   : > { %838 = vsyncadd (!%p636_p2), %s484_s7, 4294967040  ;;  %s1209_s23 = sld [smem:[#allocation13_spill]]  ;;  %s1210_s30 = sld [smem:[#allocation14_spill]] }
 0x2b3   : > { %p22_p6 = scmp.ge.s32.totalorder %s958_s9, 4   ;;  %s1211_s21 = smov %s845_s22 }
 0x2b4   : > { %s1214_s24 = smov %s958_s9 }
 0x2b5   :  { %24 = sbr.rel (!%p22_p6) target bundleno = 10 (0xa), region = 106 }
 0x2b8   : > { %s1212_s22 = smov %s1209_s23  ;;  %s1213_s23 = smov %s1210_s30 }
 0x2bc   :  { %489 = vsyncpa [#allocation3], 1 }
 0x2bd   :  { %491 = vsyncpa [#allocation3 + $0x1], 1 }
 0x2be   :  { %492 = vsyncpa [#allocation6], 1 }
 0x2bf   :  { %494 = vsyncpa [#allocation6 + $0x1], 1 }
 0x2c0   :  { %495 = vsyncpa [#allocation4], 1 }
 0x2c1   :  { %497 = vsyncpa [#allocation4 + $0x1], 1 }

</bundles_post_ra>
